<compile_context>
chip_gen: v6e
topology: v6e:2x2x1
jax: 0.10.0
libtpu: 0.0.40
codegen_flags: <defaults>
</compile_context>

<pallas_src>
import jax
import jax.numpy as jnp
from jax.experimental import pallas as pl
from jax.experimental.pallas import tpu as pltpu


# ---------------------------------------------------------------------------
# Activations (static python switch -> traced jnp ops inside the kernel)
# ---------------------------------------------------------------------------
def _make_activation(name, kwargs):
    kwargs = dict(kwargs or {})
    if name == "relu":
        return lambda h: jnp.maximum(h, 0.0)
    if name == "leaky_relu":
        slope = kwargs.get("negative_slope", 0.01)
        return lambda h: jnp.where(h >= 0, h, slope * h)
    if name == "elu":
        alpha = kwargs.get("alpha", 1.0)
        return lambda h: jnp.where(h > 0, h, alpha * (jnp.exp(h) - 1.0))
    if name == "selu":
        alpha = 1.6732632423543772
        scale = 1.0507009873554805
        return lambda h: scale * jnp.where(h > 0, h, alpha * (jnp.exp(h) - 1.0))
    if name == "celu":
        alpha = kwargs.get("alpha", 1.0)
        return lambda h: (jnp.maximum(h, 0.0)
                          + jnp.minimum(0.0, alpha * (jnp.exp(h / alpha) - 1.0)))
    if name == "softplus":
        beta = kwargs.get("beta", 1.0)
        threshold = kwargs.get("threshold", 20.0)
        return lambda h: jnp.where(beta * h > threshold, h,
                                   jnp.log1p(jnp.exp(beta * h)) / beta)
    raise ValueError(f"unsupported activation: {name}")


# ---------------------------------------------------------------------------
# Kernel
# ---------------------------------------------------------------------------
def _make_kernel(n_inter, act_fn):
    """Fused row-tile kernel: x @ W1 + b1 -> act -> ... -> @ Wout + bout."""
    def kernel(*refs):
        x_ref = refs[0]
        w_src_ref, b_src_ref = refs[1], refs[2]
        inter_refs = refs[3:3 + 2 * n_inter]
        w_dst_ref, b_dst_ref = refs[3 + 2 * n_inter], refs[4 + 2 * n_inter]
        o_ref = refs[5 + 2 * n_inter]

        h = jnp.dot(x_ref[...], w_src_ref[...],
                    preferred_element_type=jnp.float32) + b_src_ref[...]
        h = act_fn(h)
        for li in range(n_inter):
            w_ref = inter_refs[2 * li]
            b_ref = inter_refs[2 * li + 1]
            h = jnp.dot(h, w_ref[...],
                        preferred_element_type=jnp.float32) + b_ref[...]
            h = act_fn(h)
        y = jnp.dot(h, w_dst_ref[...],
                    preferred_element_type=jnp.float32) + b_dst_ref[...]
        o_ref[...] = y.astype(o_ref.dtype)

    return kernel


# ---------------------------------------------------------------------------
# Row-tile selection (VMEM-budget aware, keeps >=2 grid steps when possible)
# ---------------------------------------------------------------------------
def _choose_row_tile(n, d_src, d_mid, d_dst, n_inter, *,
                     itemsize=4, vmem_budget=48 << 20, max_tile=512):
    if n <= 8:
        return max(n, 1)
    # Resident weights (assume double-buffered by the default pipeliner).
    w_bytes = 2 * itemsize * (d_src * d_mid + n_inter * d_mid * d_mid
                              + d_mid * d_dst + (n_inter + 1) * d_mid + d_dst)
    # Per-row: double-buffered x and out tiles + in-flight activations.
    per_row = itemsize * (2 * (d_src + d_dst) + 3 * d_mid)
    budget_rows = max((vmem_budget - w_bytes) // per_row, 8)
    tm = int(min(max_tile, budget_rows, n))
    tm = max((tm // 8) * 8, 8)
    # Keep at least 2 grid steps so both TCs on v7x (megacore) get work.
    if -(-n // tm) < 2:
        tm = max(((n // 2) // 8) * 8, 8)
    return tm


# ---------------------------------------------------------------------------
# Wrapper
# ---------------------------------------------------------------------------
def nonlinear_transformation(x, params, *, activation="leaky_relu",
                             activation_kwargs=None, tm=None):
    """Pallas forward of NonlinearTransformation. x: (*, d_src) -> (*, d_dst)."""
    w_src, b_src = params["w_src"], params["b_src"]      # [Dsrc,Dmid],[1,Dmid]
    inters = params["inters"]                            # list of ([Dmid,Dmid],[1,Dmid])
    w_dst, b_dst = params["w_dst"], params["b_dst"]      # [Dmid,Ddst],[1,Ddst]

    d_src = x.shape[-1]
    d_mid = w_src.shape[1]
    d_dst = w_dst.shape[1]
    n_inter = len(inters)
    leading = x.shape[:-1]

    x2 = x.reshape(-1, d_src).astype(jnp.float32)
    n = x2.shape[0]

    if tm is None:
        tm = _choose_row_tile(n, d_src, d_mid, d_dst, n_inter)
    n_padded = int(pl.cdiv(n, tm)) * tm
    if n_padded != n:
        x2 = jnp.pad(x2, ((0, n_padded - n), (0, 0)))

    grid = (n_padded // tm,)

    in_specs = [pl.BlockSpec((tm, d_src), lambda i: (i, 0))]            # x tile
    flat_w = [w_src, b_src]
    in_specs += [pl.BlockSpec((d_src, d_mid), lambda i: (0, 0)),        # W_src
                 pl.BlockSpec((1, d_mid), lambda i: (0, 0))]            # b_src
    for (w_i, b_i) in inters:
        flat_w += [w_i, b_i]
        in_specs += [pl.BlockSpec((d_mid, d_mid), lambda i: (0, 0)),    # W_inter
                     pl.BlockSpec((1, d_mid), lambda i: (0, 0))]        # b_inter
    flat_w += [w_dst, b_dst]
    in_specs += [pl.BlockSpec((d_mid, d_dst), lambda i: (0, 0)),        # W_dst
                 pl.BlockSpec((1, d_dst), lambda i: (0, 0))]            # b_dst

    out_spec = pl.BlockSpec((tm, d_dst), lambda i: (i, 0))              # lane-dense slab

    # Explicit VMEM scope derived from the footprint (headroom, <= 56 MiB so
    # it is valid on v7x's 64 MiB physical VMEM as well as v5e/v6e).
    weight_bytes = sum(int(a.size) * 4 for a in flat_w)
    est = 2 * weight_bytes + 2 * tm * (d_src + d_dst) * 4 + 4 * tm * d_mid * 4
    vmem_limit = int(min(max(4 * est, 32 << 20), 56 << 20))

    act_fn = _make_activation(activation, activation_kwargs)
    kernel = _make_kernel(n_inter, act_fn)

    out = pl.pallas_call(
        kernel,
        out_shape=jax.ShapeDtypeStruct((n_padded, d_dst), jnp.float32),
        grid=grid,
        in_specs=in_specs,
        out_specs=out_spec,
        compiler_params=pltpu.CompilerParams(
            dimension_semantics=("parallel",),
            vmem_limit_bytes=vmem_limit),
    )(x2, *flat_w)

    if n_padded != n:
        out = out[:n]
    return out.reshape(*leading, d_dst)


# ---------------------------------------------------------------------------
# Plain-JAX reference of the same forward pass
# ---------------------------------------------------------------------------
def _reference(x, params, *, activation="leaky_relu", activation_kwargs=None):
    act = _make_activation(activation, activation_kwargs)
    h = act(x @ params["w_src"] + params["b_src"])
    for w, b in params["inters"]:
        h = act(h @ w + b)
    return h @ params["w_dst"] + params["b_dst"]


if __name__ == "__main__":
    # Small deterministic setup consistent with (*, source_dim) inputs:
    # batch=2, seq=8, source_dim=32, intermediate_dim=64, destination_dim=48,
    # intermediates_num=2, activation='leaky_relu' (PyTorch default slope 0.01).
    B, S = 2, 8
    d_src, d_mid, d_dst, n_inter = 32, 64, 48, 2

    key = jax.random.PRNGKey(0)
    keys = jax.random.split(key, 1 + 2 * (n_inter + 2))

    x = jax.random.normal(keys[0], (B, S, d_src), jnp.float32)

    def linear_params(kw, kb, din, dout):
        w = jax.random.normal(kw, (din, dout), jnp.float32) * 0.1
        b = jax.random.normal(kb, (1, dout), jnp.float32) * 0.1
        return w, b

    w_src, b_src = linear_params(keys[1], keys[2], d_src, d_mid)
    inters = []
    for i in range(n_inter):
        inters.append(linear_params(keys[3 + 2 * i], keys[4 + 2 * i],
                                    d_mid, d_mid))
    w_dst, b_dst = linear_params(keys[3 + 2 * n_inter], keys[4 + 2 * n_inter],
                                 d_mid, d_dst)

    params = {"w_src": w_src, "b_src": b_src, "inters": inters,
              "w_dst": w_dst, "b_dst": b_dst}

    out = nonlinear_transformation(x, params)
    out = jax.block_until_ready(out)

    ref = _reference(x, params)
    assert out.shape == ref.shape and out.dtype == ref.dtype
    assert jnp.allclose(out, ref, atol=1e-4, rtol=1e-4), "mismatch vs reference"

    print("KERNEL_OK")
</pallas_src>

<mosaic_0001>
module attributes {stable_mosaic.version = 11 : i64} {
  func.func @kernel(%arg0: i32, %arg1: memref<8x32xf32, #tpu.memory_space<vmem>>, %arg2: memref<32x64xf32, #tpu.memory_space<vmem>>, %arg3: memref<1x64xf32, #tpu.memory_space<vmem>>, %arg4: memref<64x64xf32, #tpu.memory_space<vmem>>, %arg5: memref<1x64xf32, #tpu.memory_space<vmem>>, %arg6: memref<64x64xf32, #tpu.memory_space<vmem>>, %arg7: memref<1x64xf32, #tpu.memory_space<vmem>>, %arg8: memref<64x48xf32, #tpu.memory_space<vmem>>, %arg9: memref<1x48xf32, #tpu.memory_space<vmem>>, %arg10: memref<8x48xf32, #tpu.memory_space<vmem>>) attributes {dimension_semantics = [#tpu.dimension_semantics<parallel>], iteration_bounds = array<i64: 2>, scalar_prefetch = 0 : i64, scratch_operands = 0 : i64, tpu.core_type = #tpu.core_type<tc>, window_params = [{transform_indices = @transform_0, window_bounds = array<i64: 8, 32>}, {pipeline_mode = #tpu.pipeline_mode<synchronous>, transform_indices = @transform_1, window_bounds = array<i64: 32, 64>}, {pipeline_mode = #tpu.pipeline_mode<synchronous>, transform_indices = @transform_2, window_bounds = array<i64: 1, 64>}, {pipeline_mode = #tpu.pipeline_mode<synchronous>, transform_indices = @transform_3, window_bounds = array<i64: 64, 64>}, {pipeline_mode = #tpu.pipeline_mode<synchronous>, transform_indices = @transform_4, window_bounds = array<i64: 1, 64>}, {pipeline_mode = #tpu.pipeline_mode<synchronous>, transform_indices = @transform_5, window_bounds = array<i64: 64, 64>}, {pipeline_mode = #tpu.pipeline_mode<synchronous>, transform_indices = @transform_6, window_bounds = array<i64: 1, 64>}, {pipeline_mode = #tpu.pipeline_mode<synchronous>, transform_indices = @transform_7, window_bounds = array<i64: 64, 48>}, {pipeline_mode = #tpu.pipeline_mode<synchronous>, transform_indices = @transform_8, window_bounds = array<i64: 1, 48>}, {transform_indices = @transform_9, window_bounds = array<i64: 8, 48>}]} {
    %c0 = arith.constant 0 : index
    %c0_0 = arith.constant 0 : index
    %0 = vector.load %arg1[%c0, %c0_0] : memref<8x32xf32, #tpu.memory_space<vmem>>, vector<8x32xf32>
    %c0_1 = arith.constant 0 : index
    %c0_2 = arith.constant 0 : index
    %1 = vector.load %arg2[%c0_1, %c0_2] : memref<32x64xf32, #tpu.memory_space<vmem>>, vector<32x64xf32>
    %cst = arith.constant dense<0.000000e+00> : vector<8x64xf32>
    %2 = tpu.matmul %0, %1, %cst {dimension_numbers = #tpu.dot_dimension_numbers<[1], [0], [0], [1], [0, 0, 1, 1], [], []>} : vector<8x32xf32>, vector<32x64xf32>, vector<8x64xf32> -> vector<8x64xf32>
    %c0_3 = arith.constant 0 : index
    %c0_4 = arith.constant 0 : index
    %3 = vector.load %arg3[%c0_3, %c0_4] : memref<1x64xf32, #tpu.memory_space<vmem>>, vector<1x64xf32>
    %4 = vector.broadcast %3 : vector<1x64xf32> to vector<8x64xf32>
    %5 = arith.addf %2, %4 : vector<8x64xf32>
    %cst_5 = arith.constant 0.000000e+00 : f32
    %6 = vector.broadcast %cst_5 : f32 to vector<8x64xf32>
    %7 = arith.cmpf oge, %5, %6 : vector<8x64xf32>
    %cst_6 = arith.constant 0.00999999977 : f32
    %8 = vector.broadcast %cst_6 : f32 to vector<8x64xf32>
    %9 = arith.mulf %8, %5 : vector<8x64xf32>
    %10 = arith.select %7, %5, %9 : vector<8x64xi1>, vector<8x64xf32>
    %c0_7 = arith.constant 0 : index
    %c0_8 = arith.constant 0 : index
    %11 = vector.load %arg4[%c0_7, %c0_8] : memref<64x64xf32, #tpu.memory_space<vmem>>, vector<64x64xf32>
    %cst_9 = arith.constant dense<0.000000e+00> : vector<8x64xf32>
    %12 = tpu.matmul %10, %11, %cst_9 {dimension_numbers = #tpu.dot_dimension_numbers<[1], [0], [0], [1], [0, 0, 1, 1], [], []>} : vector<8x64xf32>, vector<64x64xf32>, vector<8x64xf32> -> vector<8x64xf32>
    %c0_10 = arith.constant 0 : index
    %c0_11 = arith.constant 0 : index
    %13 = vector.load %arg5[%c0_10, %c0_11] : memref<1x64xf32, #tpu.memory_space<vmem>>, vector<1x64xf32>
    %14 = vector.broadcast %13 : vector<1x64xf32> to vector<8x64xf32>
    %15 = arith.addf %12, %14 : vector<8x64xf32>
    %cst_12 = arith.constant 0.000000e+00 : f32
    %16 = vector.broadcast %cst_12 : f32 to vector<8x64xf32>
    %17 = arith.cmpf oge, %15, %16 : vector<8x64xf32>
    %cst_13 = arith.constant 0.00999999977 : f32
    %18 = vector.broadcast %cst_13 : f32 to vector<8x64xf32>
    %19 = arith.mulf %18, %15 : vector<8x64xf32>
    %20 = arith.select %17, %15, %19 : vector<8x64xi1>, vector<8x64xf32>
    %c0_14 = arith.constant 0 : index
    %c0_15 = arith.constant 0 : index
    %21 = vector.load %arg6[%c0_14, %c0_15] : memref<64x64xf32, #tpu.memory_space<vmem>>, vector<64x64xf32>
    %cst_16 = arith.constant dense<0.000000e+00> : vector<8x64xf32>
    %22 = tpu.matmul %20, %21, %cst_16 {dimension_numbers = #tpu.dot_dimension_numbers<[1], [0], [0], [1], [0, 0, 1, 1], [], []>} : vector<8x64xf32>, vector<64x64xf32>, vector<8x64xf32> -> vector<8x64xf32>
    %c0_17 = arith.constant 0 : index
    %c0_18 = arith.constant 0 : index
    %23 = vector.load %arg7[%c0_17, %c0_18] : memref<1x64xf32, #tpu.memory_space<vmem>>, vector<1x64xf32>
    %24 = vector.broadcast %23 : vector<1x64xf32> to vector<8x64xf32>
    %25 = arith.addf %22, %24 : vector<8x64xf32>
    %cst_19 = arith.constant 0.000000e+00 : f32
    %26 = vector.broadcast %cst_19 : f32 to vector<8x64xf32>
    %27 = arith.cmpf oge, %25, %26 : vector<8x64xf32>
    %cst_20 = arith.constant 0.00999999977 : f32
    %28 = vector.broadcast %cst_20 : f32 to vector<8x64xf32>
    %29 = arith.mulf %28, %25 : vector<8x64xf32>
    %30 = arith.select %27, %25, %29 : vector<8x64xi1>, vector<8x64xf32>
    %c0_21 = arith.constant 0 : index
    %c0_22 = arith.constant 0 : index
    %31 = vector.load %arg8[%c0_21, %c0_22] : memref<64x48xf32, #tpu.memory_space<vmem>>, vector<64x48xf32>
    %cst_23 = arith.constant dense<0.000000e+00> : vector<8x48xf32>
    %32 = tpu.matmul %30, %31, %cst_23 {dimension_numbers = #tpu.dot_dimension_numbers<[1], [0], [0], [1], [0, 0, 1, 1], [], []>} : vector<8x64xf32>, vector<64x48xf32>, vector<8x48xf32> -> vector<8x48xf32>
    %c0_24 = arith.constant 0 : index
    %c0_25 = arith.constant 0 : index
    %33 = vector.load %arg9[%c0_24, %c0_25] : memref<1x48xf32, #tpu.memory_space<vmem>>, vector<1x48xf32>
    %34 = vector.broadcast %33 : vector<1x48xf32> to vector<8x48xf32>
    %35 = arith.addf %32, %34 : vector<8x48xf32>
    %c0_26 = arith.constant 0 : index
    %c0_27 = arith.constant 0 : index
    %36 = vector.load %arg10[%c0_26, %c0_27] : memref<8x48xf32, #tpu.memory_space<vmem>>, vector<8x48xf32>
    tpu.vector_store %arg10[%c0_26, %c0_27], %35 {strides = array<i32>} : memref<8x48xf32, #tpu.memory_space<vmem>>, vector<8x48xf32>,
    return
  }
  func.func @transform_0(%arg0: i32) -> (i32, i32) {
    %c0_i32 = arith.constant 0 : i32
    %c0_i32_0 = arith.constant 0 : i32
    return %arg0, %c0_i32 : i32, i32
  }
  func.func @transform_1(%arg0: i32) -> (i32, i32) {
    %c0_i32 = arith.constant 0 : i32
    %c0_i32_0 = arith.constant 0 : i32
    %c0_i32_1 = arith.constant 0 : i32
    return %c0_i32, %c0_i32_0 : i32, i32
  }
  func.func @transform_2(%arg0: i32) -> (i32, i32) {
    %c0_i32 = arith.constant 0 : i32
    %c0_i32_0 = arith.constant 0 : i32
    %c0_i32_1 = arith.constant 0 : i32
    return %c0_i32, %c0_i32_0 : i32, i32
  }
  func.func @transform_3(%arg0: i32) -> (i32, i32) {
    %c0_i32 = arith.constant 0 : i32
    %c0_i32_0 = arith.constant 0 : i32
    %c0_i32_1 = arith.constant 0 : i32
    return %c0_i32, %c0_i32_0 : i32, i32
  }
  func.func @transform_4(%arg0: i32) -> (i32, i32) {
    %c0_i32 = arith.constant 0 : i32
    %c0_i32_0 = arith.constant 0 : i32
    %c0_i32_1 = arith.constant 0 : i32
    return %c0_i32, %c0_i32_0 : i32, i32
  }
  func.func @transform_5(%arg0: i32) -> (i32, i32) {
    %c0_i32 = arith.constant 0 : i32
    %c0_i32_0 = arith.constant 0 : i32
    %c0_i32_1 = arith.constant 0 : i32
    return %c0_i32, %c0_i32_0 : i32, i32
  }
  func.func @transform_6(%arg0: i32) -> (i32, i32) {
    %c0_i32 = arith.constant 0 : i32
    %c0_i32_0 = arith.constant 0 : i32
    %c0_i32_1 = arith.constant 0 : i32
    return %c0_i32, %c0_i32_0 : i32, i32
  }
  func.func @transform_7(%arg0: i32) -> (i32, i32) {
    %c0_i32 = arith.constant 0 : i32
    %c0_i32_0 = arith.constant 0 : i32
    %c0_i32_1 = arith.constant 0 : i32
    return %c0_i32, %c0_i32_0 : i32, i32
  }
  func.func @transform_8(%arg0: i32) -> (i32, i32) {
    %c0_i32 = arith.constant 0 : i32
    %c0_i32_0 = arith.constant 0 : i32
    %c0_i32_1 = arith.constant 0 : i32
    return %c0_i32, %c0_i32_0 : i32, i32
  }
  func.func @transform_9(%arg0: i32) -> (i32, i32) {
    %c0_i32 = arith.constant 0 : i32
    %c0_i32_0 = arith.constant 0 : i32
    return %arg0, %c0_i32 : i32, i32
  }
}

</mosaic_0001>

<bundles_post_ra>
// kernel: tpu_custom_call.1
= control target key start
LH: loop header
LB: loop body
LE: loop exit
PB: predicated region body
PF: predicated region fallthrough
CT: control target
= control target key end

     0   :  { %14 = vsyncpa [#allocation3], 0  ;;  %s1334_s0 = inlined_call_operand.vmem [shape: f32[16,32], index: 0, kind: input, shape index: {}]   ;;  %s1335_s1 = inlined_call_operand.vmem [shape: f32[32,64], index: 1, kind: input, shape index: {}]   ;;  %s1336_s2 = inlined_call_operand.vmem [shape: f32[1,64], index: 2, kind: input, shape index: {}]   ;;  %s1337_s3 = inlined_call_operand.vmem [shape: f32[64,64], index: 3, kind: input, shape index: {}]   ;;  %s1338_s4 = inlined_call_operand.vmem [shape: f32[1,64], index: 4, kind: input, shape index: {}]   ;;  %s1339_s5 = inlined_call_operand.hbm [shape: f32[64,64], index: 5, kind: input, shape index: {}]   ;;  %s1340_s6 = inlined_call_operand.vmem [shape: f32[1,64], index: 6, kind: input, shape index: {}]   ;;  %s1341_s7 = inlined_call_operand.vmem [shape: f32[64,48], index: 7, kind: input, shape index: {}]   ;;  %s1342_s8 = inlined_call_operand.vmem [shape: f32[1,48], index: 8, kind: input, shape index: {}]   ;;  %s1343_s9 = inlined_call_operand.hbm [shape: f32[16,48], index: 9, kind: output, shape index: {}]  }
   0x1   :  { %15 = vsyncpa [#allocation4], 0 }
   0x2   :  { %17 = vsyncpa [#allocation4 + $0x1], 0  ;;  %s1112_s30 = smov 0   ;;  %s1114_s10 = smov 0  }
   0x3   :  { %s1116_s11 = smov 0   ;;  %s1118_s12 = smov 0  }
   0x4 LB: > { %s1133_s13 = sadd.s32 4294967295, %s1054_s12   ;;  %s790_s14 = sadd.s32 4294967294, %s1054_s12   ;;  %s1054_s12 = sphi %s1118_s12, %s1351_s12   ;;  %s1050_s11 = sphi %s1116_s11, %s1350_s11   ;;  %s1046_s10 = sphi %s1114_s10, %s1349_s10   ;;  %s1042_s30 = sphi %s1112_s30, %s1348_s30  }
   0x5   : > { %s1137_s15 = sadd.s32 1, %s1054_s12   ;;  %s224_s16 = sadd.s32 1, %s1050_s11 }
   0x6   : > { %s221_s17 = ssub.s32 %s1054_s12, %s1137_s15  ;;  %p234_p0 = scmp.ne.s32.totalorder %s1050_s11, %s1046_s10 }
   0x7   : > { %p222_p1 = scmp.eq.s32.totalorder %s221_s17, 0  ;;  %p235_p2 = scmp.eq.s32.totalorder %s1133_s13, 1 }
   0x8   : > { %p240_p3 = scmp.ne.s32.totalorder %s1046_s10, %s1042_s30  ;;  %p241_p4 = scmp.eq.s32.totalorder %s790_s14, 1 }
   0x9   : > { %s1148_s18 = scalar_select %p222_p1, %s1050_s11, %s224_s16  }
   0xa   : > { %p1150_p5 = por %p235_p2, %p234_p0  ;;  %p1154_p6 = por %p241_p4, %p240_p3 }
   0xb   : > { %p791_p7 = scmp.ge.s32.totalorder %s1054_s12, 1  ;;  %p248_p8 = scmp.lt.s32.totalorder %s1054_s12, 3 }
   0xc   : > { %s1345_s20 = scalar_select %p1154_p6, 1, 0 }
   0xd   : > { %p924_p9 = scmp.eq.s32.totalorder %s1133_s13, 0  ;;  %p1161_p10 = pnand %p791_p7, %p248_p8 }
   0xe   : > { %s1056_s22 = smov [#allocation2]  }
   0xf   : > { %s272_s23 = sshll.u32 %s1056_s22, 4  ;;  %p916_p11 = pneg %p1161_p10  ;;  %s273_s23 = int_to_ptr.vmem [resolvable:$true] %s272_s23 }
  0x10   : > { %s975_s24 = scalar_lea.vmem %s273_s23, 1024  ;;  %p983_p3 = scmp.lt.s32.totalorder %s273_s23, %s273_s23 }
  0x11   : > { %p917_p12 = pnand %p924_p9, %p916_p11  ;;  %p976_p0 = scmp.ne.s32.totalorder %s273_s23, %s975_s24 }
  0x12   : > { %p984_p4 = scmp.lt.s32.totalorder %s975_s24, %s975_s24 }
  0x13   : > { %p966_p13 = pneg %p917_p12 }
  0x14   : > { %p985_p6 = por %p984_p4, %p983_p3 }
  0x15   : > { %p978_p1 = pnand %p976_p0, %p966_p13 }
  0x17   : > { %p979_p2 = pneg %p978_p1 }
  0x19   : > { %p986_p7 = pnand %p985_p6, %p979_p2 }
  0x1b   : > { %989 = shalt.err (!%p986_p7)
}
  0x1c   : > { %s1057_s25 = smov 128   ;;  %s1058_s26 = smov 8  }
  0x1d   : > { %919 = dma.hbm_to_vmem [thread:$0]  (!%p917_p12), %s1339_s5, 1024, %s273_s23, [#allocation3], %s1057_s25, %s1057_s25, %s1058_s26  }
  0x1e   : > { %304 = sbr.rel (%p1161_p10) target bundleno = 848 (0x350), region = 56 }
  0x23   : > { %1033 = dma.done.wait (%p924_p9), [#allocation3], 1024  }
  0x24   : > { %1035 = vsyncadd (%p924_p9), [#allocation3], 4294966272  ;;  %p339_p8 = scmp.lt.s32.totalorder %s1133_s13, 1  ;;  %v1059_v0 = vmov 0.0   ;;  %vm1060_vm0 = vmmov 0   ;;  %v347_v1 = vld [vmem:[%s1335_s1 + $0x18] sm:$0xff] }
  0x25   : > { %842 = vmatprep.subr.mxu0 %v1059_v0  ;;  %850 = vmatprep.mubr.msk.f32.mxu0 %vm1060_vm0, %v1059_v0  ;;  %v346_v2 = vld [vmem:[%s1335_s1 + $0x10] sm:$0xff]  ;;  %v439_v3 = vld [vmem:[%s1337_s3 + $0x38] sm:$0xff]  ;;  %v345_v4 = vld [vmem:[%s1335_s1 + $0x8] sm:$0xff]  ;;  %vm355_vm1 = vcmask 261120   ;;  %vm447_vm3 = vcmask 523264   ;;  %s336_s21 = sand.u32 1, %s1046_s10  }
  0x26   : > { %s340_s29 = scalar_select %p339_p8, %s1133_s13, 1  ;;  %853 = vmatprep.subr.mxu1 %v1059_v0  ;;  %869 = vmatprep.mubr.msk.f32.mxu1 %vm1060_vm0, %v1059_v0  ;;  %v438_v5 = vld [vmem:[%s1337_s3 + $0x30] sm:$0xff]  ;;  %v437_v6 = vld [vmem:[%s1337_s3 + $0x28] sm:$0xff]  ;;  %v344_v7 = vld [vmem:[%s1335_s1] sm:$0xff]  ;;  %vm703_vm6 = vcmask 392192  }
  0x27   : > { %843 = vmatpush3.msra.mxu0 %v347_v1  ;;  %854 = vmatpush3.msra.mxu1 %v439_v3  ;;  %v436_v9 = vld [vmem:[%s1337_s3 + $0x20] sm:$0xff]  ;;  %v435_v10 = vld [vmem:[%s1337_s3 + $0x18] sm:$0xff]  ;;  %v434_v11 = vld [vmem:[%s1337_s3 + $0x10] sm:$0xff]  ;;  %s796_s22 = sshll.u32 %s336_s21, 3  ;;  %s706_s16 = scalar_lea.sflag [#allocation4], %s336_s21 }
  0x28   : > { %s797_s14 = sshll.u32 %s340_s29, 3  ;;  %844 = vmatprep.subr.mxu0 %v1059_v0  ;;  %855 = vmatprep.subr.mxu1 %v1059_v0  ;;  %v433_v12 = vld [vmem:[%s1337_s3 + $0x8] sm:$0xff]  ;;  %v432_v13 = vld [vmem:[%s1337_s3] sm:$0xff]  ;;  %v531_v14 = vld [vmem:[#allocation2 + $0x38] sm:$0xff]  ;;  %s338_s25 = scalar_lea.vmem [#allocation5], %s796_s22 }
  0x29   : > { %s342_s29 = scalar_lea.vmem %s1334_s0, %s797_s14  ;;  %845 = vmatpush3.msra.mxu0 %v346_v2  ;;  %856 = vmatpush3.msra.mxu1 %v438_v5  ;;  %v530_v15 = vld [vmem:[#allocation2 + $0x30] sm:$0xff]  ;;  %v529_v16 = vld [vmem:[#allocation2 + $0x28] sm:$0xff]  ;;  %v528_v17 = vld [vmem:[#allocation2 + $0x20] sm:$0xff]  ;;  %s807_s14 = sshll.u32 %s1133_s13, 7 }
  0x2a   : > { %846 = vmatprep.subr.mxu0 %v1059_v0  ;;  %v343_v8 = vld [vmem:[%s342_s29] sm:$0xff]  ;;  %857 = vmatprep.subr.mxu1 %v1059_v0  ;;  %v527_v18 = vld [vmem:[#allocation2 + $0x18] sm:$0xff]  ;;  %v526_v25 = vld [vmem:[#allocation2 + $0x10] sm:$0xff]  ;;  %s719_s26 = sshll.u32 %s338_s25, 4  ;;  %s1299_s29 = scalar_lea.hbm %s1343_s9, %s807_s14  ;;  %s720_s26 = int_to_ptr.vmem [resolvable:$true] %s719_s26 }
  0x2b   : > { %847 = vmatpush3.msra.mxu0 %v345_v4  ;;  %858 = vmatpush3.msra.mxu1 %v437_v6  ;;  %v798_v19 = vld [vmem:[%s1336_s2] ss:$0 sm:$0xff]  ;;  %v525_v26 = vld [vmem:[#allocation2 + $0x8] sm:$0xff]  ;;  %v622_v28 = vld [vmem:[%s1341_s7 + $0x38] sm:$0xff]  ;;  %s990_s17 = scalar_lea.vmem %s720_s26, 128  ;;  %s1061_s13 = smov [#allocation5]  }
  0x2c   : > { %848 = vmatprep.subr.mxu0 %v1059_v0  ;;  %859 = vmatprep.subr.mxu1 %v1059_v0  ;;  %v524_v27 = vld [vmem:[#allocation2] sm:$0xff]  ;;  %v621_v29 = vld [vmem:[%s1341_s7 + $0x30] sm:$0xff]  ;;  %v620_v30 = vld [vmem:[%s1341_s7 + $0x28] sm:$0xff]  ;;  %p991_p6 = scmp.ne.s32.totalorder %s720_s26, %s990_s17  ;;  %s994_s22 = sshll.u32 %s1061_s13, 4  ;;  %s995_s22 = int_to_ptr.vmem [resolvable:$false] %s994_s22 }
  0x2d   : > { %849 = vmatpush3.msra.mxu0 %v344_v7  ;;  %860 = vmatpush3.msra.mxu1 %v436_v9  ;;  %v619_v31 = vld [vmem:[%s1341_s7 + $0x20] sm:$0xff]  ;;  %v618_v32 = vld [vmem:[%s1341_s7 + $0x18] sm:$0xff]  ;;  %v617_v39 = vld [vmem:[%s1341_s7 + $0x10] sm:$0xff]  ;;  %s996_s23 = scalar_lea.vmem %s995_s22, 256  ;;  %p997_p11 = scmp.lt.s32.totalorder %s720_s26, %s995_s22 }
  0x2e   : > { %851 = vmatmul.mubr.msk.f32.vlgmr.msra.gmra.mxu0 %vm355_vm1, %v343_v8  ;;  %861 = vmatprep.subr.mxu1 %v1059_v0  ;;  %v800_v33 = vld [vmem:[%s1338_s4] ss:$0 sm:$0xff]  ;;  %v616_v40 = vld [vmem:[%s1341_s7 + $0x8] sm:$0xff]  ;;  %p992_p9 = pnand %p991_p6, %p1150_p5  ;;  %p998_p12 = scmp.lt.s32.totalorder %s996_s23, %s990_s17 }
  0x2f   : > { %872 = vmatprep.subr.mxu0 %v1059_v0  ;;  %862 = vmatpush3.msra.mxu1 %v435_v10  ;;  %v615_v41 = vld [vmem:[%s1341_s7] sm:$0xff] }
  0x30   : > { %888 = vmatprep.mubr.msk.f32.mxu0 %vm1060_vm0, %v1059_v0  ;;  %863 = vmatprep.subr.mxu1 %v1059_v0  ;;  %v802_v42 = vld [vmem:[%s1340_s6] ss:$0 sm:$0xff]  ;;  %p993_p10 = pneg %p992_p9  ;;  %p999_p13 = por %p998_p12, %p997_p11 }
  0x31   : > { %864 = vmatpush3.msra.mxu1 %v434_v11  ;;  %873 = vmatpush3.msra.mxu0 %v531_v14  ;;  %v804_v48 = vld [vmem:[%s1342_s8] ss:$0 sm:$0xff] }
  0x32   : > { %865 = vmatprep.subr.mxu1 %v1059_v0  ;;  %874 = vmatprep.subr.mxu0 %v1059_v0  ;;  %p1000_p0 = pnand %p999_p13, %p993_p10 }
  0x33   : > { %866 = vmatpush3.msra.mxu1 %v433_v12  ;;  %875 = vmatpush3.msra.mxu0 %v530_v15 }
  0x34   : > { %867 = vmatprep.subr.mxu1 %v1059_v0  ;;  %876 = vmatprep.subr.mxu0 %v1059_v0 }
  0x35   : > { %868 = vmatpush3.msra.mxu1 %v432_v13  ;;  %877 = vmatpush3.msra.mxu0 %v529_v16 }
  0x36   : > { %891 = vmatprep.subr.mxu1 %v1059_v0  ;;  %878 = vmatprep.subr.mxu0 %v1059_v0 }
  0x37   : > { %879 = vmatpush3.msra.mxu0 %v528_v17 }
  0x38   : > { %880 = vmatprep.subr.mxu0 %v1059_v0 }
  0x39   : > { %881 = vmatpush3.msra.mxu0 %v527_v18 }
  0x3a   : > { %882 = vmatprep.subr.mxu0 %v1059_v0 }
  0x3b   : > { %883 = vmatpush3.msra.mxu0 %v526_v25 }
  0x3c   : > { %884 = vmatprep.subr.mxu0 %v1059_v0 }
  0x3d   : > { %885 = vmatpush3.msra.mxu0 %v525_v26 }
  0x3e   : > { %886 = vmatprep.subr.mxu0 %v1059_v0 }
  0x3f   : > { %887 = vmatpush3.msra.mxu0 %v524_v27 }
  0xee   : > { %v425_v20 = vpop.f32.mrf.mxu0 }
  0xef   : > { %v426_v21 = vadd.f32 %v798_v19, %v425_v20 }
  0xf0   : > { %v852_v22 = vpop.f32.mrf.mxu0 }
  0xf1   : > { %vm429_vm2 = vcmp.ge.f32.partialorder %v426_v21, 0.0  ;;  %v430_v23 = vmul.f32 0.01, %v426_v21 }
  0xf3   : > { %v431_v24 = vsel %vm429_vm2, %v426_v21, %v430_v23 }
  0xf4   : > { %870 = vmatmul.mubr.msk.f32.vlgmr.msra.gmra.mxu1 %vm447_vm3, %v431_v24 }
  0xf5   : > { %907 = vmatprep.mubr.msk.f32.mxu1 %vm1060_vm0, %v1059_v0  ;;  %892 = vmatpush3.msra.mxu1 %v622_v28 }
  0xf6   : > { %893 = vmatprep.subr.mxu1 %v1059_v0 }
  0xf7   : > { %894 = vmatpush3.msra.mxu1 %v621_v29 }
  0xf8   : > { %895 = vmatprep.subr.mxu1 %v1059_v0 }
  0xf9   : > { %896 = vmatpush3.msra.mxu1 %v620_v30 }
  0xfa   : > { %897 = vmatprep.subr.mxu1 %v1059_v0 }
  0xfb   : > { %898 = vmatpush3.msra.mxu1 %v619_v31 }
  0xfc   : > { %899 = vmatprep.subr.mxu1 %v1059_v0 }
  0xfd   : > { %900 = vmatpush3.msra.mxu1 %v618_v32 }
  0xfe   : > { %901 = vmatprep.subr.mxu1 %v1059_v0 }
  0xff   : > { %902 = vmatpush3.msra.mxu1 %v617_v39 }
 0x100   : > { %903 = vmatprep.subr.mxu1 %v1059_v0 }
 0x101   : > { %904 = vmatpush3.msra.mxu1 %v616_v40 }
 0x102   : > { %905 = vmatprep.subr.mxu1 %v1059_v0 }
 0x103   : > { %906 = vmatpush3.msra.mxu1 %v615_v41 }
 0x1b4   : > { %v517_v34 = vpop.f32.mrf.mxu1 }
 0x1b5   : > { %v518_v35 = vadd.f32 %v800_v33, %v517_v34 }
 0x1b6   : > { %v871_v36 = vpop.f32.mrf.mxu1 }
 0x1b7   : > { %vm521_vm4 = vcmp.ge.f32.partialorder %v518_v35, 0.0  ;;  %v522_v37 = vmul.f32 0.01, %v518_v35 }
 0x1b9   : > { %v523_v38 = vsel %vm521_vm4, %v518_v35, %v522_v37 }
 0x1ba   : > { %889 = vmatmul.mubr.msk.f32.vlgmr.msra.gmra.mxu0 %vm447_vm3, %v523_v38 }
 0x27a   : > { %v608_v43 = vpop.f32.mrf.mxu0 }
 0x27b   : > { %v609_v44 = vadd.f32 %v802_v42, %v608_v43 }
 0x27c   : > { %v890_v45 = vpop.f32.mrf.mxu0 }
 0x27d   : > { %vm612_vm5 = vcmp.ge.f32.partialorder %v609_v44, 0.0  ;;  %v613_v46 = vmul.f32 0.01, %v609_v44 }
 0x27f   : > { %v614_v47 = vsel %vm612_vm5, %v609_v44, %v613_v46 }
 0x280   : > { %908 = vmatmul.mubr.msk.f32.vlgmr.msra.gmra.mxu1 %vm447_vm3, %v614_v47 }
 0x340   : > { %v699_v49 = vpop.f32.mrf.mxu1 }
 0x341   : > { %v700_v50 = vadd.f32 %v804_v48, %v699_v49 }
 0x342   : > { %v909_v51 = vpop.f32.mrf.mxu1 }
 0x343   : > { %704 = vst.msk [vmem:[%s338_s25] sm:$0xff] %vm703_vm6, %v700_v50 }
 0x344   : > { %1003 = shalt.err (!%p1000_p0)
}
 0x345   : > { %s1004_s24 = scalar_lea.hbm %s1299_s29, 128  ;;  %s1008_s25 = scalar_lea.hbm %s1343_s9, 256 }
 0x346   : > { %p1005_p1 = scmp.ne.s32.totalorder %s1299_s29, %s1004_s24  ;;  %p1009_p4 = scmp.lt.s32.totalorder %s1299_s29, %s1343_s9 }
 0x347   : > { %p1010_p7 = scmp.lt.s32.totalorder %s1008_s25, %s1004_s24 }
 0x348   : > { %p1006_p2 = pnand %p1005_p1, %p1150_p5 }
 0x349   : > { %p1011_p8 = por %p1010_p7, %p1009_p4 }
 0x34a   : > { %p1007_p3 = pneg %p1006_p2 }
 0x34c   : > { %p1012_p6 = pnand %p1011_p8, %p1007_p3 }
 0x34e   : > { %1015 = shalt.err (!%p1012_p6)
}
 0x34f   : > { %914 = dma.vmem_to_hbm [thread:$0]  (%p1150_p5), %s720_s26, 128, %s1299_s29, %s706_s16  }
 0x350 PF: > { %p926_p9 = scmp.ge.s32.totalorder %s1054_s12, 2  ;;  %s731_s17 = sand.u32 1, %s1042_s30  }
 0x351   : > { %p1347_p10 = scmp.ne.s32.totalorder %s1345_s20, 0  ;;  %s732_s13 = scalar_lea.sflag [#allocation4], %s731_s17 }
 0x353   : > { %p921_p11 = pnand %p926_p9, %p1347_p10 }
 0x355   : > { %p922_p12 = pneg %p921_p11 }
 0x357   : > { %1037 = dma.done.wait (%p922_p12), %s732_s13, 128  }
 0x358   : > { %1039 = vsyncadd (%p922_p12), %s732_s13, 4294967168  ;;  %p20_p13 = scmp.ge.s32.totalorder %s1137_s15, 4   ;;  %s1348_s30 = smov %s1046_s10 }
 0x359   : > { %s1349_s10 = smov %s1050_s11  ;;  %s1350_s11 = smov %s1148_s18 }
 0x35a   : > { %s1351_s12 = smov %s1137_s15  ;;  %22 = sbr.rel (!%p20_p13) target bundleno = 4 (0x4), region = 96 }
 0x35f   :  { %737 = vsyncpa [#allocation3], 1 }
 0x360   :  { %739 = vsyncpa [#allocation3 + $0x1], 1 }
 0x361   :  { %740 = vsyncpa [#allocation4], 1 }
 0x362   :  { %742 = vsyncpa [#allocation4 + $0x1], 1 }

</bundles_post_ra>
